<compile_context>
chip_gen: v5e
topology: v5e:2x2
jax: 0.10.0
libtpu: 0.0.40
codegen_flags: <defaults>
</compile_context>

<pallas_src>
import jax
import jax.numpy as jnp
import numpy as np
from jax import lax
from jax.experimental import pallas as pl
from jax.experimental.pallas import tpu as pltpu  # noqa: F401  (kept for scaling TODOs)


# ----------------------------------------------------------------------------
# Fused kernel: input projection -> LSTM recurrence -> Linear + log_softmax
# ----------------------------------------------------------------------------
def lstm_tagger_kernel(x_ref, wih_ref, whh_ref, b_ref, wtag_ref, btag_ref, out_ref):
    T, B, E = x_ref.shape
    H = whh_ref.shape[0]
    G = 4 * H

    # ---- Hoisted input projection (off the serial chain): one MXU matmul ---
    x_flat = x_ref[...].reshape(T * B, E)                       # time-major rows
    gx = jnp.dot(x_flat, wih_ref[...],
                 preferred_element_type=jnp.float32) + b_ref[...]
    gx = gx.reshape(T, B, G)                                    # gx[t] = aligned (B, 4H) tile

    whh = whh_ref[...]                                          # (H, 4H) bf16, loaded once

    # Lane mask: tanh lanes [2H, 3H) carry the 'g' gate; i|f|o lanes use sigmoid.
    lane = lax.broadcasted_iota(jnp.int32, (B, G), 1)
    is_g = (lane >= 2 * H) & (lane < 3 * H)

    h = jnp.zeros((B, H), jnp.float32)
    c = jnp.zeros((B, H), jnp.float32)
    hs = []                                                     # h_t stays in vregs

    # ---- Recurrence: fully unrolled; only h @ W_hh is on the serial path ---
    for t in range(T):                                          # static trip count
        gates = gx[t] + jnp.dot(h.astype(jnp.bfloat16), whh,
                                preferred_element_type=jnp.float32)
        # Single EUP transcendental per step: sigmoid(x) = 0.5 * (1 + tanh(x/2)).
        y = jnp.tanh(jnp.where(is_g, gates, 0.5 * gates))
        act = jnp.where(is_g, y, 0.5 * (y + 1.0))
        i_g = act[:, 0 * H:1 * H]
        f_g = act[:, 1 * H:2 * H]
        g_g = act[:, 2 * H:3 * H]
        o_g = act[:, 3 * H:4 * H]
        c = f_g * c + i_g * g_g
        h = o_g * jnp.tanh(c)
        hs.append(h)

    # ---- Fused tag head epilogue: (T*B, H) @ (H, V) + stable log_softmax ---
    hs_flat = jnp.concatenate(hs, axis=0)                       # (T*B, H), time-major
    logits = jnp.dot(hs_flat, wtag_ref[...],
                     preferred_element_type=jnp.float32) + btag_ref[...]
    m = jnp.max(logits, axis=-1, keepdims=True)
    z = logits - m
    lse = jnp.log(jnp.sum(jnp.exp(z), axis=-1, keepdims=True))
    out_ref[...] = (z - lse).astype(out_ref.dtype)              # lane-dense (T*B, V)


def lstm_tagger_pallas(emb_tbe, wih_t, whh_t, bias, wtag_t, btag):
    """emb_tbe: (T, B, E) f32 embedded tokens, time-major.

    Pre-packed weights: wih_t (E, 4H) f32, whh_t (H, 4H) bf16, bias (1, 4H) f32,
    wtag_t (H, V) f32, btag (1, V) f32.  Returns (T*B, V) log-probs, time-major.
    """
    T, B, E = emb_tbe.shape
    H = whh_t.shape[0]
    V = wtag_t.shape[1]

    return pl.pallas_call(
        lstm_tagger_kernel,
        out_shape=jax.ShapeDtypeStruct((T * B, V), jnp.float32),
        in_specs=[
            pl.BlockSpec((T, B, E), lambda: (0, 0, 0)),
            pl.BlockSpec((E, 4 * H), lambda: (0, 0)),
            pl.BlockSpec((H, 4 * H), lambda: (0, 0)),
            pl.BlockSpec((1, 4 * H), lambda: (0, 0)),
            pl.BlockSpec((H, V), lambda: (0, 0)),
            pl.BlockSpec((1, V), lambda: (0, 0)),
        ],
        out_specs=pl.BlockSpec((T * B, V), lambda: (0, 0)),
    )(emb_tbe, wih_t, whh_t, bias, wtag_t, btag)


# ----------------------------------------------------------------------------
# One-time weight packing (outside jit): transposes + bias sum + bf16 W_hh
# ----------------------------------------------------------------------------
def prepare_params(raw):
    V = raw["w_tag"].shape[0]
    return {
        "emb": jnp.asarray(raw["emb"], jnp.float32),
        "wih_t": jnp.asarray(raw["w_ih"], jnp.float32).T,                     # (E, 4H)
        "whh_t": jnp.asarray(raw["w_hh"], jnp.float32).T.astype(jnp.bfloat16),  # (H, 4H)
        "bias": (jnp.asarray(raw["b_ih"], jnp.float32)
                 + jnp.asarray(raw["b_hh"], jnp.float32)).reshape(1, -1),     # (1, 4H)
        "wtag_t": jnp.asarray(raw["w_tag"], jnp.float32).T,                   # (H, V)
        "btag": jnp.asarray(raw["b_tag"], jnp.float32).reshape(1, V),         # (1, V)
    }


# ----------------------------------------------------------------------------
# Full forward (glue: embedding gather in plain JAX — scales to real vocabs)
# ----------------------------------------------------------------------------
@jax.jit
def lstm_tagger_forward(tokens, packed):
    B, T = tokens.shape
    V = packed["wtag_t"].shape[1]
    emb = jnp.take(packed["emb"], tokens, axis=0)               # (B, T, E)
    emb_tbe = jnp.transpose(emb, (1, 0, 2))                     # time-major (T, B, E)
    out_tb = lstm_tagger_pallas(emb_tbe, packed["wih_t"], packed["whh_t"],
                                packed["bias"], packed["wtag_t"], packed["btag"])
    # Tiny off-critical-path reorder back to PyTorch's (B, T, V).
    return jnp.transpose(out_tb.reshape(T, B, V), (1, 0, 2))


# ----------------------------------------------------------------------------
# Pure-JAX (f32) reference for validation
# ----------------------------------------------------------------------------
def reference_forward(tokens, params):
    B, T = tokens.shape
    H = params["w_hh"].shape[1]
    emb = params["emb"][tokens]                                 # (B, T, E)
    x_tbe = jnp.transpose(emb, (1, 0, 2))

    def step(carry, x_t):
        h, c = carry
        gates = (x_t @ params["w_ih"].T + h @ params["w_hh"].T
                 + params["b_ih"] + params["b_hh"])
        i = jax.nn.sigmoid(gates[:, 0 * H:1 * H])
        f = jax.nn.sigmoid(gates[:, 1 * H:2 * H])
        g = jnp.tanh(gates[:, 2 * H:3 * H])
        o = jax.nn.sigmoid(gates[:, 3 * H:4 * H])
        c_new = f * c + i * g
        h_new = o * jnp.tanh(c_new)
        return (h_new, c_new), h_new

    h0 = jnp.zeros((B, H), jnp.float32)
    (_, _), hs = jax.lax.scan(step, (h0, h0), x_tbe)            # (T, B, H)
    h_flat = jnp.transpose(hs, (1, 0, 2)).reshape(B * T, H)
    logits = h_flat @ params["w_tag"].T + params["b_tag"]
    logp = jax.nn.log_softmax(logits, axis=1)
    return logp.reshape(B, T, -1)


if __name__ == "__main__":
    # Small shapes consistent with the module's forward.
    vocab_size = 128
    embedding_dim = 32
    hidden_dim = 32
    batch_size = 4
    max_sent_length = 8

    key = jax.random.PRNGKey(0)
    keys = jax.random.split(key, 8)

    raw_params = {
        # deterministic stand-in for the GloVe embedding table
        "emb": jax.random.normal(keys[0], (vocab_size, embedding_dim), jnp.float32) * 0.1,
        "w_ih": jax.random.normal(keys[1], (4 * hidden_dim, embedding_dim), jnp.float32) * 0.1,
        "w_hh": jax.random.normal(keys[2], (4 * hidden_dim, hidden_dim), jnp.float32) * 0.1,
        "b_ih": jax.random.normal(keys[3], (4 * hidden_dim,), jnp.float32) * 0.1,
        "b_hh": jax.random.normal(keys[4], (4 * hidden_dim,), jnp.float32) * 0.1,
        "w_tag": jax.random.normal(keys[5], (vocab_size, hidden_dim), jnp.float32) * 0.1,
        "b_tag": jax.random.normal(keys[6], (vocab_size,), jnp.float32) * 0.1,
    }
    packed_params = prepare_params(raw_params)   # one-time pack, outside jit

    tokens = jax.random.randint(
        keys[7], (batch_size, max_sent_length), 0, vocab_size, dtype=jnp.int32
    )

    out = lstm_tagger_forward(tokens, packed_params)
    out = jax.block_until_ready(out)

    ref = jax.block_until_ready(reference_forward(tokens, raw_params))
    # Tolerance slightly loosened vs. pure-f32 to account for the intentional
    # bf16 recurrence matmul (f32 accumulation kept).
    np.testing.assert_allclose(np.asarray(out), np.asarray(ref), rtol=5e-3, atol=5e-3)
    assert out.shape == (batch_size, max_sent_length, vocab_size)

    print("KERNEL_OK")
</pallas_src>

<mosaic_0001>
module attributes {stable_mosaic.version = 11 : i64} {
  func.func @lstm_tagger_kernel(%arg0: memref<8x4x32xf32, #tpu.memory_space<vmem>>, %arg1: memref<32x128xf32, #tpu.memory_space<vmem>>, %arg2: memref<32x128xbf16, #tpu.memory_space<vmem>>, %arg3: memref<1x128xf32, #tpu.memory_space<vmem>>, %arg4: memref<32x128xf32, #tpu.memory_space<vmem>>, %arg5: memref<1x128xf32, #tpu.memory_space<vmem>>, %arg6: memref<32x128xf32, #tpu.memory_space<vmem>>) attributes {dimension_semantics = [], scalar_prefetch = 0 : i64, scratch_operands = 0 : i64, tpu.core_type = #tpu.core_type<tc>} {
    %c0 = arith.constant 0 : index
    %c0_0 = arith.constant 0 : index
    %c0_1 = arith.constant 0 : index
    %0 = vector.load %arg0[%c0, %c0_0, %c0_1] : memref<8x4x32xf32, #tpu.memory_space<vmem>>, vector<8x4x32xf32>
    %1 = vector.shape_cast %0 : vector<8x4x32xf32> to vector<32x32xf32>
    %c0_2 = arith.constant 0 : index
    %c0_3 = arith.constant 0 : index
    %2 = vector.load %arg1[%c0_2, %c0_3] : memref<32x128xf32, #tpu.memory_space<vmem>>, vector<32x128xf32>
    %cst = arith.constant dense<0.000000e+00> : vector<32x128xf32>
    %3 = tpu.matmul %1, %2, %cst {dimension_numbers = #tpu.dot_dimension_numbers<[1], [0], [0], [1], [0, 0, 1, 1], [], []>} : vector<32x32xf32>, vector<32x128xf32>, vector<32x128xf32> -> vector<32x128xf32>
    %c0_4 = arith.constant 0 : index
    %c0_5 = arith.constant 0 : index
    %4 = vector.load %arg3[%c0_4, %c0_5] : memref<1x128xf32, #tpu.memory_space<vmem>>, vector<1x128xf32>
    %5 = vector.broadcast %4 : vector<1x128xf32> to vector<32x128xf32>
    %6 = arith.addf %3, %5 : vector<32x128xf32>
    %7 = vector.shape_cast %6 : vector<32x128xf32> to vector<8x4x128xf32>
    %c0_6 = arith.constant 0 : index
    %c0_7 = arith.constant 0 : index
    %8 = vector.load %arg2[%c0_6, %c0_7] : memref<32x128xbf16, #tpu.memory_space<vmem>>, vector<32x128xbf16>
    %9 = tpu.iota {dimensions = array<i32: 1>} : vector<4x128xi32>
    %c64_i32 = arith.constant 64 : i32
    %10 = vector.broadcast %c64_i32 : i32 to vector<4x128xi32>
    %11 = arith.cmpi sge, %9, %10 : vector<4x128xi32>
    %c96_i32 = arith.constant 96 : i32
    %12 = vector.broadcast %c96_i32 : i32 to vector<4x128xi32>
    %13 = arith.cmpi slt, %9, %12 : vector<4x128xi32>
    %14 = arith.andi %11, %13 : vector<4x128xi1>
    %cst_8 = arith.constant 0.000000e+00 : f32
    %15 = vector.broadcast %cst_8 : f32 to vector<4x32xf32>
    %cst_9 = arith.constant 0.000000e+00 : f32
    %16 = vector.broadcast %cst_9 : f32 to vector<4x32xf32>
    %17 = vector.extract_strided_slice %7 {offsets = [0, 0, 0], sizes = [1, 4, 128], strides = [1, 1, 1]} : vector<8x4x128xf32> to vector<1x4x128xf32>
    %18 = vector.shape_cast %17 : vector<1x4x128xf32> to vector<4x128xf32>
    %19 = arith.truncf %15 : vector<4x32xf32> to vector<4x32xbf16>
    %cst_10 = arith.constant dense<0.000000e+00> : vector<4x128xf32>
    %20 = tpu.matmul %19, %8, %cst_10 {dimension_numbers = #tpu.dot_dimension_numbers<[1], [0], [0], [1], [0, 0, 1, 1], [], []>} : vector<4x32xbf16>, vector<32x128xbf16>, vector<4x128xf32> -> vector<4x128xf32>
    %21 = arith.addf %18, %20 : vector<4x128xf32>
    %cst_11 = arith.constant 5.000000e-01 : f32
    %22 = vector.broadcast %cst_11 : f32 to vector<4x128xf32>
    %23 = arith.mulf %22, %21 : vector<4x128xf32>
    %24 = arith.select %14, %21, %23 : vector<4x128xi1>, vector<4x128xf32>
    %25 = math.tanh %24 : vector<4x128xf32>
    %cst_12 = arith.constant 1.000000e+00 : f32
    %26 = vector.broadcast %cst_12 : f32 to vector<4x128xf32>
    %27 = arith.addf %25, %26 : vector<4x128xf32>
    %cst_13 = arith.constant 5.000000e-01 : f32
    %28 = vector.broadcast %cst_13 : f32 to vector<4x128xf32>
    %29 = arith.mulf %28, %27 : vector<4x128xf32>
    %30 = arith.select %14, %25, %29 : vector<4x128xi1>, vector<4x128xf32>
    %31 = vector.extract_strided_slice %30 {offsets = [0, 0], sizes = [4, 32], strides = [1, 1]} : vector<4x128xf32> to vector<4x32xf32>
    %32 = vector.extract_strided_slice %30 {offsets = [0, 32], sizes = [4, 32], strides = [1, 1]} : vector<4x128xf32> to vector<4x32xf32>
    %33 = vector.extract_strided_slice %30 {offsets = [0, 64], sizes = [4, 32], strides = [1, 1]} : vector<4x128xf32> to vector<4x32xf32>
    %34 = vector.extract_strided_slice %30 {offsets = [0, 96], sizes = [4, 32], strides = [1, 1]} : vector<4x128xf32> to vector<4x32xf32>
    %35 = arith.mulf %32, %16 : vector<4x32xf32>
    %36 = arith.mulf %31, %33 : vector<4x32xf32>
    %37 = arith.addf %35, %36 : vector<4x32xf32>
    %38 = math.tanh %37 : vector<4x32xf32>
    %39 = arith.mulf %34, %38 : vector<4x32xf32>
    %40 = vector.extract_strided_slice %7 {offsets = [1, 0, 0], sizes = [1, 4, 128], strides = [1, 1, 1]} : vector<8x4x128xf32> to vector<1x4x128xf32>
    %41 = vector.shape_cast %40 : vector<1x4x128xf32> to vector<4x128xf32>
    %42 = arith.truncf %39 : vector<4x32xf32> to vector<4x32xbf16>
    %cst_14 = arith.constant dense<0.000000e+00> : vector<4x128xf32>
    %43 = tpu.matmul %42, %8, %cst_14 {dimension_numbers = #tpu.dot_dimension_numbers<[1], [0], [0], [1], [0, 0, 1, 1], [], []>} : vector<4x32xbf16>, vector<32x128xbf16>, vector<4x128xf32> -> vector<4x128xf32>
    %44 = arith.addf %41, %43 : vector<4x128xf32>
    %cst_15 = arith.constant 5.000000e-01 : f32
    %45 = vector.broadcast %cst_15 : f32 to vector<4x128xf32>
    %46 = arith.mulf %45, %44 : vector<4x128xf32>
    %47 = arith.select %14, %44, %46 : vector<4x128xi1>, vector<4x128xf32>
    %48 = math.tanh %47 : vector<4x128xf32>
    %cst_16 = arith.constant 1.000000e+00 : f32
    %49 = vector.broadcast %cst_16 : f32 to vector<4x128xf32>
    %50 = arith.addf %48, %49 : vector<4x128xf32>
    %cst_17 = arith.constant 5.000000e-01 : f32
    %51 = vector.broadcast %cst_17 : f32 to vector<4x128xf32>
    %52 = arith.mulf %51, %50 : vector<4x128xf32>
    %53 = arith.select %14, %48, %52 : vector<4x128xi1>, vector<4x128xf32>
    %54 = vector.extract_strided_slice %53 {offsets = [0, 0], sizes = [4, 32], strides = [1, 1]} : vector<4x128xf32> to vector<4x32xf32>
    %55 = vector.extract_strided_slice %53 {offsets = [0, 32], sizes = [4, 32], strides = [1, 1]} : vector<4x128xf32> to vector<4x32xf32>
    %56 = vector.extract_strided_slice %53 {offsets = [0, 64], sizes = [4, 32], strides = [1, 1]} : vector<4x128xf32> to vector<4x32xf32>
    %57 = vector.extract_strided_slice %53 {offsets = [0, 96], sizes = [4, 32], strides = [1, 1]} : vector<4x128xf32> to vector<4x32xf32>
    %58 = arith.mulf %55, %37 : vector<4x32xf32>
    %59 = arith.mulf %54, %56 : vector<4x32xf32>
    %60 = arith.addf %58, %59 : vector<4x32xf32>
    %61 = math.tanh %60 : vector<4x32xf32>
    %62 = arith.mulf %57, %61 : vector<4x32xf32>
    %63 = vector.extract_strided_slice %7 {offsets = [2, 0, 0], sizes = [1, 4, 128], strides = [1, 1, 1]} : vector<8x4x128xf32> to vector<1x4x128xf32>
    %64 = vector.shape_cast %63 : vector<1x4x128xf32> to vector<4x128xf32>
    %65 = arith.truncf %62 : vector<4x32xf32> to vector<4x32xbf16>
    %cst_18 = arith.constant dense<0.000000e+00> : vector<4x128xf32>
    %66 = tpu.matmul %65, %8, %cst_18 {dimension_numbers = #tpu.dot_dimension_numbers<[1], [0], [0], [1], [0, 0, 1, 1], [], []>} : vector<4x32xbf16>, vector<32x128xbf16>, vector<4x128xf32> -> vector<4x128xf32>
    %67 = arith.addf %64, %66 : vector<4x128xf32>
    %cst_19 = arith.constant 5.000000e-01 : f32
    %68 = vector.broadcast %cst_19 : f32 to vector<4x128xf32>
    %69 = arith.mulf %68, %67 : vector<4x128xf32>
    %70 = arith.select %14, %67, %69 : vector<4x128xi1>, vector<4x128xf32>
    %71 = math.tanh %70 : vector<4x128xf32>
    %cst_20 = arith.constant 1.000000e+00 : f32
    %72 = vector.broadcast %cst_20 : f32 to vector<4x128xf32>
    %73 = arith.addf %71, %72 : vector<4x128xf32>
    %cst_21 = arith.constant 5.000000e-01 : f32
    %74 = vector.broadcast %cst_21 : f32 to vector<4x128xf32>
    %75 = arith.mulf %74, %73 : vector<4x128xf32>
    %76 = arith.select %14, %71, %75 : vector<4x128xi1>, vector<4x128xf32>
    %77 = vector.extract_strided_slice %76 {offsets = [0, 0], sizes = [4, 32], strides = [1, 1]} : vector<4x128xf32> to vector<4x32xf32>
    %78 = vector.extract_strided_slice %76 {offsets = [0, 32], sizes = [4, 32], strides = [1, 1]} : vector<4x128xf32> to vector<4x32xf32>
    %79 = vector.extract_strided_slice %76 {offsets = [0, 64], sizes = [4, 32], strides = [1, 1]} : vector<4x128xf32> to vector<4x32xf32>
    %80 = vector.extract_strided_slice %76 {offsets = [0, 96], sizes = [4, 32], strides = [1, 1]} : vector<4x128xf32> to vector<4x32xf32>
    %81 = arith.mulf %78, %60 : vector<4x32xf32>
    %82 = arith.mulf %77, %79 : vector<4x32xf32>
    %83 = arith.addf %81, %82 : vector<4x32xf32>
    %84 = math.tanh %83 : vector<4x32xf32>
    %85 = arith.mulf %80, %84 : vector<4x32xf32>
    %86 = vector.extract_strided_slice %7 {offsets = [3, 0, 0], sizes = [1, 4, 128], strides = [1, 1, 1]} : vector<8x4x128xf32> to vector<1x4x128xf32>
    %87 = vector.shape_cast %86 : vector<1x4x128xf32> to vector<4x128xf32>
    %88 = arith.truncf %85 : vector<4x32xf32> to vector<4x32xbf16>
    %cst_22 = arith.constant dense<0.000000e+00> : vector<4x128xf32>
    %89 = tpu.matmul %88, %8, %cst_22 {dimension_numbers = #tpu.dot_dimension_numbers<[1], [0], [0], [1], [0, 0, 1, 1], [], []>} : vector<4x32xbf16>, vector<32x128xbf16>, vector<4x128xf32> -> vector<4x128xf32>
    %90 = arith.addf %87, %89 : vector<4x128xf32>
    %cst_23 = arith.constant 5.000000e-01 : f32
    %91 = vector.broadcast %cst_23 : f32 to vector<4x128xf32>
    %92 = arith.mulf %91, %90 : vector<4x128xf32>
    %93 = arith.select %14, %90, %92 : vector<4x128xi1>, vector<4x128xf32>
    %94 = math.tanh %93 : vector<4x128xf32>
    %cst_24 = arith.constant 1.000000e+00 : f32
    %95 = vector.broadcast %cst_24 : f32 to vector<4x128xf32>
    %96 = arith.addf %94, %95 : vector<4x128xf32>
    %cst_25 = arith.constant 5.000000e-01 : f32
    %97 = vector.broadcast %cst_25 : f32 to vector<4x128xf32>
    %98 = arith.mulf %97, %96 : vector<4x128xf32>
    %99 = arith.select %14, %94, %98 : vector<4x128xi1>, vector<4x128xf32>
    %100 = vector.extract_strided_slice %99 {offsets = [0, 0], sizes = [4, 32], strides = [1, 1]} : vector<4x128xf32> to vector<4x32xf32>
    %101 = vector.extract_strided_slice %99 {offsets = [0, 32], sizes = [4, 32], strides = [1, 1]} : vector<4x128xf32> to vector<4x32xf32>
    %102 = vector.extract_strided_slice %99 {offsets = [0, 64], sizes = [4, 32], strides = [1, 1]} : vector<4x128xf32> to vector<4x32xf32>
    %103 = vector.extract_strided_slice %99 {offsets = [0, 96], sizes = [4, 32], strides = [1, 1]} : vector<4x128xf32> to vector<4x32xf32>
    %104 = arith.mulf %101, %83 : vector<4x32xf32>
    %105 = arith.mulf %100, %102 : vector<4x32xf32>
    %106 = arith.addf %104, %105 : vector<4x32xf32>
    %107 = math.tanh %106 : vector<4x32xf32>
    %108 = arith.mulf %103, %107 : vector<4x32xf32>
    %109 = vector.extract_strided_slice %7 {offsets = [4, 0, 0], sizes = [1, 4, 128], strides = [1, 1, 1]} : vector<8x4x128xf32> to vector<1x4x128xf32>
    %110 = vector.shape_cast %109 : vector<1x4x128xf32> to vector<4x128xf32>
    %111 = arith.truncf %108 : vector<4x32xf32> to vector<4x32xbf16>
    %cst_26 = arith.constant dense<0.000000e+00> : vector<4x128xf32>
    %112 = tpu.matmul %111, %8, %cst_26 {dimension_numbers = #tpu.dot_dimension_numbers<[1], [0], [0], [1], [0, 0, 1, 1], [], []>} : vector<4x32xbf16>, vector<32x128xbf16>, vector<4x128xf32> -> vector<4x128xf32>
    %113 = arith.addf %110, %112 : vector<4x128xf32>
    %cst_27 = arith.constant 5.000000e-01 : f32
    %114 = vector.broadcast %cst_27 : f32 to vector<4x128xf32>
    %115 = arith.mulf %114, %113 : vector<4x128xf32>
    %116 = arith.select %14, %113, %115 : vector<4x128xi1>, vector<4x128xf32>
    %117 = math.tanh %116 : vector<4x128xf32>
    %cst_28 = arith.constant 1.000000e+00 : f32
    %118 = vector.broadcast %cst_28 : f32 to vector<4x128xf32>
    %119 = arith.addf %117, %118 : vector<4x128xf32>
    %cst_29 = arith.constant 5.000000e-01 : f32
    %120 = vector.broadcast %cst_29 : f32 to vector<4x128xf32>
    %121 = arith.mulf %120, %119 : vector<4x128xf32>
    %122 = arith.select %14, %117, %121 : vector<4x128xi1>, vector<4x128xf32>
    %123 = vector.extract_strided_slice %122 {offsets = [0, 0], sizes = [4, 32], strides = [1, 1]} : vector<4x128xf32> to vector<4x32xf32>
    %124 = vector.extract_strided_slice %122 {offsets = [0, 32], sizes = [4, 32], strides = [1, 1]} : vector<4x128xf32> to vector<4x32xf32>
    %125 = vector.extract_strided_slice %122 {offsets = [0, 64], sizes = [4, 32], strides = [1, 1]} : vector<4x128xf32> to vector<4x32xf32>
    %126 = vector.extract_strided_slice %122 {offsets = [0, 96], sizes = [4, 32], strides = [1, 1]} : vector<4x128xf32> to vector<4x32xf32>
    %127 = arith.mulf %124, %106 : vector<4x32xf32>
    %128 = arith.mulf %123, %125 : vector<4x32xf32>
    %129 = arith.addf %127, %128 : vector<4x32xf32>
    %130 = math.tanh %129 : vector<4x32xf32>
    %131 = arith.mulf %126, %130 : vector<4x32xf32>
    %132 = vector.extract_strided_slice %7 {offsets = [5, 0, 0], sizes = [1, 4, 128], strides = [1, 1, 1]} : vector<8x4x128xf32> to vector<1x4x128xf32>
    %133 = vector.shape_cast %132 : vector<1x4x128xf32> to vector<4x128xf32>
    %134 = arith.truncf %131 : vector<4x32xf32> to vector<4x32xbf16>
    %cst_30 = arith.constant dense<0.000000e+00> : vector<4x128xf32>
    %135 = tpu.matmul %134, %8, %cst_30 {dimension_numbers = #tpu.dot_dimension_numbers<[1], [0], [0], [1], [0, 0, 1, 1], [], []>} : vector<4x32xbf16>, vector<32x128xbf16>, vector<4x128xf32> -> vector<4x128xf32>
    %136 = arith.addf %133, %135 : vector<4x128xf32>
    %cst_31 = arith.constant 5.000000e-01 : f32
    %137 = vector.broadcast %cst_31 : f32 to vector<4x128xf32>
    %138 = arith.mulf %137, %136 : vector<4x128xf32>
    %139 = arith.select %14, %136, %138 : vector<4x128xi1>, vector<4x128xf32>
    %140 = math.tanh %139 : vector<4x128xf32>
    %cst_32 = arith.constant 1.000000e+00 : f32
    %141 = vector.broadcast %cst_32 : f32 to vector<4x128xf32>
    %142 = arith.addf %140, %141 : vector<4x128xf32>
    %cst_33 = arith.constant 5.000000e-01 : f32
    %143 = vector.broadcast %cst_33 : f32 to vector<4x128xf32>
    %144 = arith.mulf %143, %142 : vector<4x128xf32>
    %145 = arith.select %14, %140, %144 : vector<4x128xi1>, vector<4x128xf32>
    %146 = vector.extract_strided_slice %145 {offsets = [0, 0], sizes = [4, 32], strides = [1, 1]} : vector<4x128xf32> to vector<4x32xf32>
    %147 = vector.extract_strided_slice %145 {offsets = [0, 32], sizes = [4, 32], strides = [1, 1]} : vector<4x128xf32> to vector<4x32xf32>
    %148 = vector.extract_strided_slice %145 {offsets = [0, 64], sizes = [4, 32], strides = [1, 1]} : vector<4x128xf32> to vector<4x32xf32>
    %149 = vector.extract_strided_slice %145 {offsets = [0, 96], sizes = [4, 32], strides = [1, 1]} : vector<4x128xf32> to vector<4x32xf32>
    %150 = arith.mulf %147, %129 : vector<4x32xf32>
    %151 = arith.mulf %146, %148 : vector<4x32xf32>
    %152 = arith.addf %150, %151 : vector<4x32xf32>
    %153 = math.tanh %152 : vector<4x32xf32>
    %154 = arith.mulf %149, %153 : vector<4x32xf32>
    %155 = vector.extract_strided_slice %7 {offsets = [6, 0, 0], sizes = [1, 4, 128], strides = [1, 1, 1]} : vector<8x4x128xf32> to vector<1x4x128xf32>
    %156 = vector.shape_cast %155 : vector<1x4x128xf32> to vector<4x128xf32>
    %157 = arith.truncf %154 : vector<4x32xf32> to vector<4x32xbf16>
    %cst_34 = arith.constant dense<0.000000e+00> : vector<4x128xf32>
    %158 = tpu.matmul %157, %8, %cst_34 {dimension_numbers = #tpu.dot_dimension_numbers<[1], [0], [0], [1], [0, 0, 1, 1], [], []>} : vector<4x32xbf16>, vector<32x128xbf16>, vector<4x128xf32> -> vector<4x128xf32>
    %159 = arith.addf %156, %158 : vector<4x128xf32>
    %cst_35 = arith.constant 5.000000e-01 : f32
    %160 = vector.broadcast %cst_35 : f32 to vector<4x128xf32>
    %161 = arith.mulf %160, %159 : vector<4x128xf32>
    %162 = arith.select %14, %159, %161 : vector<4x128xi1>, vector<4x128xf32>
    %163 = math.tanh %162 : vector<4x128xf32>
    %cst_36 = arith.constant 1.000000e+00 : f32
    %164 = vector.broadcast %cst_36 : f32 to vector<4x128xf32>
    %165 = arith.addf %163, %164 : vector<4x128xf32>
    %cst_37 = arith.constant 5.000000e-01 : f32
    %166 = vector.broadcast %cst_37 : f32 to vector<4x128xf32>
    %167 = arith.mulf %166, %165 : vector<4x128xf32>
    %168 = arith.select %14, %163, %167 : vector<4x128xi1>, vector<4x128xf32>
    %169 = vector.extract_strided_slice %168 {offsets = [0, 0], sizes = [4, 32], strides = [1, 1]} : vector<4x128xf32> to vector<4x32xf32>
    %170 = vector.extract_strided_slice %168 {offsets = [0, 32], sizes = [4, 32], strides = [1, 1]} : vector<4x128xf32> to vector<4x32xf32>
    %171 = vector.extract_strided_slice %168 {offsets = [0, 64], sizes = [4, 32], strides = [1, 1]} : vector<4x128xf32> to vector<4x32xf32>
    %172 = vector.extract_strided_slice %168 {offsets = [0, 96], sizes = [4, 32], strides = [1, 1]} : vector<4x128xf32> to vector<4x32xf32>
    %173 = arith.mulf %170, %152 : vector<4x32xf32>
    %174 = arith.mulf %169, %171 : vector<4x32xf32>
    %175 = arith.addf %173, %174 : vector<4x32xf32>
    %176 = math.tanh %175 : vector<4x32xf32>
    %177 = arith.mulf %172, %176 : vector<4x32xf32>
    %178 = vector.extract_strided_slice %7 {offsets = [7, 0, 0], sizes = [1, 4, 128], strides = [1, 1, 1]} : vector<8x4x128xf32> to vector<1x4x128xf32>
    %179 = vector.shape_cast %178 : vector<1x4x128xf32> to vector<4x128xf32>
    %180 = arith.truncf %177 : vector<4x32xf32> to vector<4x32xbf16>
    %cst_38 = arith.constant dense<0.000000e+00> : vector<4x128xf32>
    %181 = tpu.matmul %180, %8, %cst_38 {dimension_numbers = #tpu.dot_dimension_numbers<[1], [0], [0], [1], [0, 0, 1, 1], [], []>} : vector<4x32xbf16>, vector<32x128xbf16>, vector<4x128xf32> -> vector<4x128xf32>
    %182 = arith.addf %179, %181 : vector<4x128xf32>
    %cst_39 = arith.constant 5.000000e-01 : f32
    %183 = vector.broadcast %cst_39 : f32 to vector<4x128xf32>
    %184 = arith.mulf %183, %182 : vector<4x128xf32>
    %185 = arith.select %14, %182, %184 : vector<4x128xi1>, vector<4x128xf32>
    %186 = math.tanh %185 : vector<4x128xf32>
    %cst_40 = arith.constant 1.000000e+00 : f32
    %187 = vector.broadcast %cst_40 : f32 to vector<4x128xf32>
    %188 = arith.addf %186, %187 : vector<4x128xf32>
    %cst_41 = arith.constant 5.000000e-01 : f32
    %189 = vector.broadcast %cst_41 : f32 to vector<4x128xf32>
    %190 = arith.mulf %189, %188 : vector<4x128xf32>
    %191 = arith.select %14, %186, %190 : vector<4x128xi1>, vector<4x128xf32>
    %192 = vector.extract_strided_slice %191 {offsets = [0, 0], sizes = [4, 32], strides = [1, 1]} : vector<4x128xf32> to vector<4x32xf32>
    %193 = vector.extract_strided_slice %191 {offsets = [0, 32], sizes = [4, 32], strides = [1, 1]} : vector<4x128xf32> to vector<4x32xf32>
    %194 = vector.extract_strided_slice %191 {offsets = [0, 64], sizes = [4, 32], strides = [1, 1]} : vector<4x128xf32> to vector<4x32xf32>
    %195 = vector.extract_strided_slice %191 {offsets = [0, 96], sizes = [4, 32], strides = [1, 1]} : vector<4x128xf32> to vector<4x32xf32>
    %196 = arith.mulf %193, %175 : vector<4x32xf32>
    %197 = arith.mulf %192, %194 : vector<4x32xf32>
    %198 = arith.addf %196, %197 : vector<4x32xf32>
    %199 = math.tanh %198 : vector<4x32xf32>
    %200 = arith.mulf %195, %199 : vector<4x32xf32>
    %201 = tpu.concatenate %39, %62, %85, %108, %131, %154, %177, %200 in 0 : vector<4x32xf32>, vector<4x32xf32>, vector<4x32xf32>, vector<4x32xf32>, vector<4x32xf32>, vector<4x32xf32>, vector<4x32xf32>, vector<4x32xf32> -> vector<32x32xf32>
    %c0_42 = arith.constant 0 : index
    %c0_43 = arith.constant 0 : index
    %202 = vector.load %arg4[%c0_42, %c0_43] : memref<32x128xf32, #tpu.memory_space<vmem>>, vector<32x128xf32>
    %cst_44 = arith.constant dense<0.000000e+00> : vector<32x128xf32>
    %203 = tpu.matmul %201, %202, %cst_44 {dimension_numbers = #tpu.dot_dimension_numbers<[1], [0], [0], [1], [0, 0, 1, 1], [], []>} : vector<32x32xf32>, vector<32x128xf32>, vector<32x128xf32> -> vector<32x128xf32>
    %c0_45 = arith.constant 0 : index
    %c0_46 = arith.constant 0 : index
    %204 = vector.load %arg5[%c0_45, %c0_46] : memref<1x128xf32, #tpu.memory_space<vmem>>, vector<1x128xf32>
    %205 = vector.broadcast %204 : vector<1x128xf32> to vector<32x128xf32>
    %206 = arith.addf %203, %205 : vector<32x128xf32>
    %cst_47 = arith.constant dense<0xFF800000> : vector<32xf32>
    %207 = vector.multi_reduction <maximumf>, %206, %cst_47 [1] : vector<32x128xf32> to vector<32xf32>
    %208 = vector.shape_cast %207 : vector<32xf32> to vector<32x1xf32>
    %209 = vector.broadcast %208 : vector<32x1xf32> to vector<32x128xf32>
    %210 = arith.subf %206, %209 : vector<32x128xf32>
    %211 = math.exp %210 : vector<32x128xf32>
    %cst_48 = arith.constant dense<0.000000e+00> : vector<32xf32>
    %212 = vector.multi_reduction <add>, %211, %cst_48 [1] : vector<32x128xf32> to vector<32xf32>
    %213 = vector.shape_cast %212 : vector<32xf32> to vector<32x1xf32>
    %214 = math.log %213 : vector<32x1xf32>
    %215 = vector.broadcast %214 : vector<32x1xf32> to vector<32x128xf32>
    %216 = arith.subf %210, %215 : vector<32x128xf32>
    %c0_49 = arith.constant 0 : index
    %c0_50 = arith.constant 0 : index
    %217 = vector.load %arg6[%c0_49, %c0_50] : memref<32x128xf32, #tpu.memory_space<vmem>>, vector<32x128xf32>
    tpu.vector_store %arg6[%c0_49, %c0_50], %216 {strides = array<i32>} : memref<32x128xf32, #tpu.memory_space<vmem>>, vector<32x128xf32>,
    return
  }
}

</mosaic_0001>

<bundles_post_ra>
// kernel: lstm_tagger_forward.1
= control target key start
LH: loop header
LB: loop body
LE: loop exit
PB: predicated region body
PF: predicated region fallthrough
CT: control target
= control target key end

     0   :  { %vm67_vm0 = vcmask 261120   ;;  %v686_v8 = vmov 0   ;;  %v121_v10 = vlaneseq  ;;  %s688_s13 = smov 32   ;;  %vm498_vm4 = vcmask 1043456   ;;  %s942_s1 = inlined_call_operand.vmem [shape: f32[32,128], index: 1, kind: input, shape index: {}]   ;;  %s943_s2 = inlined_call_operand.vmem [shape: bf16[32,128], index: 2, kind: input, shape index: {}]   ;;  %s944_s0 = inlined_call_operand.vmem [shape: f32[8,4,32], index: 0, kind: input, shape index: {}]   ;;  %s945_s3 = inlined_call_operand.vmem [shape: f32[1,128], index: 3, kind: input, shape index: {}]   ;;  %s946_s4 = inlined_call_operand.vmem [shape: f32[32,128], index: 4, kind: input, shape index: {}]   ;;  %s947_s5 = inlined_call_operand.vmem [shape: f32[1,128], index: 5, kind: input, shape index: {}]   ;;  %s948_s6 = inlined_call_operand.vmem [shape: f32[32,128], index: 6, kind: output, shape index: {}]  }
   0x1   :  { %v35_v0 = vld [vmem:[%s942_s1 + $0x18] sm:$0xff]  ;;  %v730_v1 = vld [vmem:[%s943_s2 + $0x8] sm:$0xff]  ;;  %v34_v2 = vld [vmem:[%s942_s1 + $0x10] sm:$0xff] }
   0x2   :  { %88 = vmatpush.msra.mxu0 %v35_v0  ;;  %v33_v3 = vld [vmem:[%s942_s1 + $0x8] sm:$0xff]  ;;  %v741_v4 = vld [vmem:[%s943_s2] sm:$0xff]  ;;  %147 = vmatpush.bf16.msra.mxu1 %v730_v1  ;;  %v122_v12 = vand.u32 127, %v121_v10  ;;  %v505_v17 = vld [vmem:[%s946_s4 + $0x10] sm:$0xff] }
   0x3   :  { %v24_v5 = vld [vmem:[%s944_s0] sm:$0xf]  ;;  %v25_v6 = vld [vmem:[%s944_s0 + $0x4] sm:$0xf]  ;;  %191 = vmatpush.bf16.msra.mxu3 %v730_v1  ;;  %323 = vmatpush.bf16.msra.mxu2 %v730_v1  ;;  %v26_v54 = vld [vmem:[%s944_s0 + $0x8] sm:$0xf] }
   0x4   :  { %89 = vmatpush.msra.mxu0 %v34_v2  ;;  %48 = vst [vmem:[#allocation1] ss:$2 sm:$0xff] %v24_v5  ;;  %v32_v7 = vld [vmem:[%s942_s1] sm:$0xff]  ;;  %vm123_vm1 = vcmp.ge.s32.totalorder %v122_v12, 64  ;;  %vm124_vm2 = vcmp.lt.s32.totalorder %v122_v12, 96 }
   0x5   :  { %50 = vst [vmem:[#allocation1 + $0x1] ss:$2 sm:$0xff] %v25_v6  ;;  %v770_v11 = vld [vmem:[%s945_s3] ss:$0 sm:$0xff]  ;;  %vm773_vm3 = vmand %vm123_vm1, %vm124_vm2  ;;  %s687_s3 = smov 64  }
   0x6   :  { %90 = vmatpush.msra.mxu0 %v33_v3  ;;  %148 = vmatpush.bf16.msra.mxu1 %v741_v4  ;;  %v27_v55 = vld [vmem:[%s944_s0 + $0xc] sm:$0xf]  ;;  %52 = vst [vmem:[#allocation1 + $0x10] ss:$2 sm:$0xff] %v26_v54 }
   0x7   :  { %192 = vmatpush.bf16.msra.mxu3 %v741_v4  ;;  %324 = vmatpush.bf16.msra.mxu2 %v741_v4  ;;  %54 = vst [vmem:[#allocation1 + $0x11] ss:$2 sm:$0xff] %v27_v55 }
   0x8   :  { %91 = vmatpush.msra.mxu0 %v32_v7 }
   0x9   :  { %149 = vmatmul.bf16.vlgmr.msra.gmra.mxu1 %v686_v8 }
   0xa   :  { %279 = vmatpush.bf16.msrb.mxu1 %v730_v1  ;;  %411 = vmatpush.bf16.msrb.mxu0 %v730_v1 }
   0xb   :  { %235 = vmatpush.bf16.msrb.mxu3 %v730_v1 }
   0xc   :  { %v63_v9 = vld.sshfl [vmem:[#allocation1] sm:$0xff pattern:$0x75316420] }
   0xd   :  { %608 = vmatmul.msk.f32.vlgmr.msra.gmra.mxu0 %vm67_vm0, %v63_v9 }
   0xe   :  { %280 = vmatpush.bf16.msrb.mxu1 %v741_v4  ;;  %412 = vmatpush.bf16.msrb.mxu0 %v741_v4  ;;  %v64_v56 = vld.sshfl [vmem:[#allocation1 + $0x10] sm:$0xff pattern:$0x75316420] }
   0xf   :  { %236 = vmatpush.bf16.msrb.mxu3 %v741_v4 }
  0x12   :  { %455 = vmatpush.bf16.msra.mxu1 %v730_v1 }
  0x15   :  { %609 = vmatmul.msk.f32.gmra.mxu0 %vm67_vm0, %v64_v56 }
  0x16   :  { %456 = vmatpush.bf16.msra.mxu1 %v741_v4 }
  0x86   :  { %v150_v13 = vpop.f32.mrf.mxu1 }
  0x8a   :  { %v93_v14 = vpop.f32.mrf.mxu0 }
  0x8b   :  { %v94_v15 = vadd.f32 %v770_v11, %v93_v14 }
  0x8d   :  { %v154_v16 = vadd.f32 %v150_v13, %v94_v15  ;;  %v109_v35 = vrot.slane %v94_v15, 4 }
  0x8e   :  { %v152_v19 = vpop.f32.mrf.mxu1 }
  0x8f   :  { %v155_v18 = vmul.f32 0.5, %v154_v16 }
  0x91   :  { %v156_v20 = vsel %vm773_vm3, %v154_v16, %v155_v18 }
  0x92   :  { %638 = vtanh.f32 %v156_v20  ;;  %v96_v58 = vpop.f32.mrf.mxu0 }
  0x93   :  { %v97_v59 = vadd.f32 %v770_v11, %v96_v58 }
  0x95   :  { %v110_v16 = vrot.slane %v97_v59, 4 }
  0x98   :  { %v639_v21 = vpop.eup %638 }
  0x99   :  { %v158_v22 = vadd.f32 1.0, %v639_v21 }
  0x9b   :  { %v159_v23 = vmul.f32 0.5, %v158_v22 }
  0x9d   :  { %v160_v24 = vsel %vm773_vm3, %v639_v21, %v159_v23 }
  0x9e   :  { %163 = vrot.lane.b32.xlu0 %v160_v24, %s687_s3  ;;  %v161_v27 = vmul.f32 0.0, %v160_v24 }
 0x110   :  { %v164_v25 = vpop.permute.xlu0 %163 }
 0x111   :  { %v166_v26 = vmul.f32 %v164_v25, %v160_v24 }
 0x113   :  { %168 = vrot.lane.b32.xlu0 %v166_v26, %s688_s13 }
 0x185   :  { %v169_v28 = vpop.permute.xlu0 %168 }
 0x186   :  { %v171_v29 = vadd.f32 %v169_v28, %v161_v27 }
 0x188   :  { %640 = vtanh.f32 %v171_v29 }
 0x18e   :  { %v641_v30 = vpop.eup %640 }
 0x18f   :  { %174 = vrot.lane.b32.xlu1 %v641_v30, %s687_s3 }
 0x201   :  { %v175_v31 = vpop.permute.xlu1 %174 }
 0x202   :  { %v784_v32 = vmul.f32 %v175_v31, %v160_v24 }
 0x204   :  { %v178_v33 = vpack.c.bf16 %v784_v32, %v784_v32 }
 0x206   :  { %180 = vrot.lane.b32.xlu1 %v178_v33, %s688_s13 }
 0x278   :  { %v181_v34 = vpop.permute.xlu1 %180 }
 0x279   :  { %620 = vmatmul.msk.bf16.vlgmr.msra.gmra.mxu3 %vm67_vm0, %v181_v34 }
 0x27a   :  { %367 = vmatpush.bf16.msra.mxu3 %v730_v1 }
 0x27e   :  { %368 = vmatpush.bf16.msra.mxu3 %v741_v4 }
 0x2fc   :  { %v194_v36 = vpop.f32.mrf.mxu3 }
 0x2fd   :  { %v198_v37 = vadd.f32 %v194_v36, %v109_v35 }
 0x2ff   :  { %v199_v38 = vmul.f32 0.5, %v198_v37 }
 0x301   :  { %v200_v39 = vsel %vm773_vm3, %v198_v37, %v199_v38  ;;  %v28_v37 = vld [vmem:[%s944_s0 + $0x10] sm:$0xf]  ;;  %v29_v38 = vld [vmem:[%s944_s0 + $0x14] sm:$0xf] }
 0x302   :  { %642 = vtanh.f32 %v200_v39  ;;  %56 = vst [vmem:[#allocation1 + $0x20] ss:$2 sm:$0xff] %v28_v37 }
 0x303   :  { %58 = vst [vmem:[#allocation1 + $0x21] ss:$2 sm:$0xff] %v29_v38 }
 0x304   :  { %v196_v40 = vpop.f32.mrf.mxu3 }
 0x308   :  { %v643_v41 = vpop.eup %642 }
 0x309   :  { %v202_v42 = vadd.f32 1.0, %v643_v41 }
 0x30a   :  { %v65_v39 = vld.sshfl [vmem:[#allocation1 + $0x20] sm:$0xff pattern:$0x75316420] }
 0x30b   :  { %v203_v43 = vmul.f32 0.5, %v202_v42  ;;  %610 = vmatmul.msk.f32.gmra.mxu0 %vm67_vm0, %v65_v39 }
 0x30d   :  { %v204_v44 = vsel %vm773_vm3, %v643_v41, %v203_v43 }
 0x30e   :  { %207 = vrot.lane.b32.xlu2 %v204_v44, %s687_s3  ;;  %v205_v47 = vmul.f32 %v204_v44, %v171_v29 }
 0x368   :  { %v208_v45 = vpop.permute.xlu2 %207 }
 0x369   :  { %v210_v46 = vmul.f32 %v208_v45, %v204_v44 }
 0x36b   :  { %212 = vrot.lane.b32.xlu2 %v210_v46, %s688_s13 }
 0x388   :  { %v99_v41 = vpop.f32.mrf.mxu0 }
 0x389   :  { %v100_v42 = vadd.f32 %v770_v11, %v99_v41 }
 0x3c5   :  { %v213_v48 = vpop.permute.xlu2 %212 }
 0x3c6   :  { %v215_v49 = vadd.f32 %v213_v48, %v205_v47 }
 0x3c8   :  { %644 = vtanh.f32 %v215_v49 }
 0x3ce   :  { %v645_v50 = vpop.eup %644 }
 0x3cf   :  { %218 = vrot.lane.b32.xlu0 %v645_v50, %s687_s3 }
 0x441   :  { %v219_v51 = vpop.permute.xlu0 %218 }
 0x442   :  { %v799_v52 = vmul.f32 %v219_v51, %v204_v44 }
 0x444   :  { %v222_v53 = vpack.c.bf16 %v799_v52, %v799_v52 }
 0x446   :  { %224 = vrot.lane.b32.xlu1 %v222_v53, %s688_s13 }
 0x4b8   :  { %v225_v57 = vpop.permute.xlu1 %224 }
 0x4b9   :  { %621 = vmatmul.msk.bf16.vlgmr.msrb.gmra.mxu3 %vm67_vm0, %v225_v57 }
 0x53c   :  { %v238_v60 = vpop.f32.mrf.mxu3 }
 0x53d   :  { %v242_v61 = vadd.f32 %v238_v60, %v97_v59 }
 0x53f   :  { %v243_v62 = vmul.f32 0.5, %v242_v61 }
 0x541   :  { %v244_v63 = vsel %vm773_vm3, %v242_v61, %v243_v62 }
 0x542   :  { %646 = vtanh.f32 %v244_v63  ;;  %v111_v63 = vrot.slane %v100_v42, 4 }
 0x544   :  { %v240_v0 = vpop.f32.mrf.mxu3 }
 0x548   :  { %v647_v1 = vpop.eup %646 }
 0x549   :  { %v246_v2 = vadd.f32 1.0, %v647_v1 }
 0x54b   :  { %v247_v3 = vmul.f32 0.5, %v246_v2 }
 0x54d   :  { %v248_v4 = vsel %vm773_vm3, %v647_v1, %v247_v3 }
 0x54e   :  { %251 = vrot.lane.b32.xlu2 %v248_v4, %s687_s3  ;;  %v249_v7 = vmul.f32 %v248_v4, %v215_v49 }
 0x5a8   :  { %v252_v5 = vpop.permute.xlu2 %251 }
 0x5a9   :  { %v254_v6 = vmul.f32 %v252_v5, %v248_v4 }
 0x5ab   :  { %256 = vrot.lane.b32.xlu0 %v254_v6, %s688_s13 }
 0x61d   :  { %v257_v8 = vpop.permute.xlu0 %256 }
 0x61e   :  { %v259_v9 = vadd.f32 %v257_v8, %v249_v7 }
 0x620   :  { %648 = vtanh.f32 %v259_v9 }
 0x626   :  { %v649_v10 = vpop.eup %648 }
 0x627   :  { %262 = vrot.lane.b32.xlu1 %v649_v10, %s687_s3 }
 0x699   :  { %v263_v12 = vpop.permute.xlu1 %262 }
 0x69a   :  { %v820_v13 = vmul.f32 %v263_v12, %v248_v4 }
 0x69c   :  { %v266_v14 = vpack.c.bf16 %v820_v13, %v820_v13 }
 0x69e   :  { %268 = vrot.lane.b32.xlu2 %v266_v14, %s688_s13 }
 0x6f8   :  { %v269_v15 = vpop.permute.xlu2 %268 }
 0x6f9   :  { %622 = vmatmul.msk.bf16.vlgmr.msrb.gmra.mxu1 %vm67_vm0, %v269_v15 }
 0x776   :  { %v282_v18 = vpop.f32.mrf.mxu1 }
 0x777   :  { %v286_v19 = vadd.f32 %v282_v18, %v110_v16  ;;  %v30_v18 = vld [vmem:[%s944_s0 + $0x18] sm:$0xf] }
 0x778   :  { %60 = vst [vmem:[#allocation1 + $0x30] ss:$2 sm:$0xff] %v30_v18 }
 0x779   :  { %v287_v20 = vmul.f32 0.5, %v286_v19 }
 0x77b   :  { %v288_v21 = vsel %vm773_vm3, %v286_v19, %v287_v20  ;;  %v31_v19 = vld [vmem:[%s944_s0 + $0x1c] sm:$0xf] }
 0x77c   :  { %650 = vtanh.f32 %v288_v21  ;;  %62 = vst [vmem:[#allocation1 + $0x31] ss:$2 sm:$0xff] %v31_v19 }
 0x77e   :  { %v284_v22 = vpop.f32.mrf.mxu1 }
 0x782   :  { %v651_v23 = vpop.eup %650 }
 0x783   :  { %v290_v24 = vadd.f32 1.0, %v651_v23  ;;  %v66_v20 = vld.sshfl [vmem:[#allocation1 + $0x30] sm:$0xff pattern:$0x75316420] }
 0x784   :  { %611 = vmatmul.msk.f32.gmra.mxu0 %vm67_vm0, %v66_v20 }
 0x785   :  { %v291_v25 = vmul.f32 0.5, %v290_v24 }
 0x787   :  { %v292_v26 = vsel %vm773_vm3, %v651_v23, %v291_v25 }
 0x788   :  { %295 = vrot.lane.b32.xlu0 %v292_v26, %s687_s3  ;;  %v293_v29 = vmul.f32 %v292_v26, %v259_v9 }
 0x7fa   :  { %v296_v27 = vpop.permute.xlu0 %295 }
 0x7fb   :  { %v298_v28 = vmul.f32 %v296_v27, %v292_v26 }
 0x7fd   :  { %300 = vrot.lane.b32.xlu1 %v298_v28, %s688_s13 }
 0x801   :  { %v102_v25 = vpop.f32.mrf.mxu0 }
 0x86f   :  { %v301_v30 = vpop.permute.xlu1 %300 }
 0x870   :  { %v303_v31 = vadd.f32 %v301_v30, %v293_v29 }
 0x872   :  { %652 = vtanh.f32 %v303_v31 }
 0x878   :  { %v653_v33 = vpop.eup %652 }
 0x879   :  { %306 = vrot.lane.b32.xlu2 %v653_v33, %s687_s3 }
 0x8d3   :  { %v307_v34 = vpop.permute.xlu2 %306 }
 0x8d4   :  { %v833_v35 = vmul.f32 %v307_v34, %v292_v26  ;;  %v103_v26 = vadd.f32 %v770_v11, %v102_v25 }
 0x8d6   :  { %v310_v36 = vpack.c.bf16 %v833_v35, %v833_v35 }
 0x8d8   :  { %312 = vrot.lane.b32.xlu0 %v310_v36, %s688_s13 }
 0x94a   :  { %v313_v40 = vpop.permute.xlu0 %312 }
 0x94b   :  { %623 = vmatmul.msk.bf16.vlgmr.msra.gmra.mxu2 %vm67_vm0, %v313_v40 }
 0x9ce   :  { %v326_v43 = vpop.f32.mrf.mxu2 }
 0x9cf   :  { %v330_v44 = vadd.f32 %v326_v43, %v100_v42 }
 0x9d1   :  { %v331_v45 = vmul.f32 0.5, %v330_v44 }
 0x9d3   :  { %v332_v46 = vsel %vm773_vm3, %v330_v44, %v331_v45 }
 0x9d4   :  { %654 = vtanh.f32 %v332_v46 }
 0x9d6   :  { %v328_v47 = vpop.f32.mrf.mxu2 }
 0x9d7   :  { %v112_v47 = vrot.slane %v103_v26, 4 }
 0x9da   :  { %v655_v48 = vpop.eup %654 }
 0x9db   :  { %v334_v49 = vadd.f32 1.0, %v655_v48 }
 0x9dd   :  { %v335_v50 = vmul.f32 0.5, %v334_v49 }
 0x9df   :  { %v336_v51 = vsel %vm773_vm3, %v655_v48, %v335_v50 }
 0x9e0   :  { %339 = vrot.lane.b32.xlu1 %v336_v51, %s687_s3  ;;  %v337_v55 = vmul.f32 %v336_v51, %v303_v31 }
 0xa52   :  { %v340_v53 = vpop.permute.xlu1 %339 }
 0xa53   :  { %v342_v54 = vmul.f32 %v340_v53, %v336_v51 }
 0xa55   :  { %344 = vrot.lane.b32.xlu2 %v342_v54, %s688_s13 }
 0xaaf   :  { %v345_v56 = vpop.permute.xlu2 %344 }
 0xab0   :  { %v347_v57 = vadd.f32 %v345_v56, %v337_v55 }
 0xab2   :  { %656 = vtanh.f32 %v347_v57 }
 0xab8   :  { %v657_v58 = vpop.eup %656 }
 0xab9   :  { %350 = vrot.lane.b32.xlu0 %v657_v58, %s687_s3  ;;  %v487_v58 = vrot.slane %v799_v52, 4 }
 0xb2b   :  { %v351_v59 = vpop.permute.xlu0 %350 }
 0xb2c   :  { %v854_v60 = vmul.f32 %v351_v59, %v336_v51  ;;  %v499_v59 = vsel %vm498_vm4, %v784_v32, %v487_v58  ;;  %v503_v32 = vld [vmem:[%s946_s4] sm:$0xff] }
 0xb2e   :  { %v354_v61 = vpack.c.bf16 %v854_v60, %v854_v60 }
 0xb30   :  { %356 = vrot.lane.b32.xlu1 %v354_v61, %s688_s13  ;;  %v506_v61 = vld [vmem:[%s946_s4 + $0x18] sm:$0xff] }
 0xb31   :  { %543 = vmatpush.msrb.mxu2 %v506_v61 }
 0xb33   :  { %544 = vmatpush.msrb.mxu2 %v505_v17 }
 0xba2   :  { %v357_v62 = vpop.permute.xlu1 %356 }
 0xba3   :  { %624 = vmatmul.msk.bf16.vlgmr.msra.gmra.mxu3 %vm67_vm0, %v357_v62  ;;  %v504_v62 = vld [vmem:[%s946_s4 + $0x8] sm:$0xff] }
 0xba4   :  { %545 = vmatpush.msrb.mxu2 %v504_v62 }
 0xba6   :  { %546 = vmatpush.msrb.mxu2 %v503_v32 }
 0xc26   :  { %v370_v0 = vpop.f32.mrf.mxu3 }
 0xc27   :  { %v374_v1 = vadd.f32 %v370_v0, %v111_v63  ;;  %v490_v0 = vrot.slane %v833_v35, 4 }
 0xc29   :  { %v375_v2 = vmul.f32 0.5, %v374_v1 }
 0xc2b   :  { %v376_v3 = vsel %vm773_vm3, %v374_v1, %v375_v2  ;;  %v500_v2 = vsel %vm498_vm4, %v820_v13, %v490_v0  ;;  %v637_v13 = vld [vmem:[%s947_s5] ss:$0 sm:$0xff] }
 0xc2c   :  { %658 = vtanh.f32 %v376_v3 }
 0xc2e   :  { %v372_v4 = vpop.f32.mrf.mxu3 }
 0xc32   :  { %v659_v5 = vpop.eup %658 }
 0xc33   :  { %v378_v6 = vadd.f32 1.0, %v659_v5 }
 0xc35   :  { %v379_v7 = vmul.f32 0.5, %v378_v6 }
 0xc37   :  { %v380_v8 = vsel %vm773_vm3, %v659_v5, %v379_v7 }
 0xc38   :  { %383 = vrot.lane.b32.xlu2 %v380_v8, %s687_s3  ;;  %v381_v12 = vmul.f32 %v380_v8, %v347_v57 }
 0xc92   :  { %v384_v9 = vpop.permute.xlu2 %383 }
 0xc93   :  { %v386_v10 = vmul.f32 %v384_v9, %v380_v8 }
 0xc95   :  { %388 = vrot.lane.b32.xlu0 %v386_v10, %s688_s13 }
 0xd07   :  { %v389_v14 = vpop.permute.xlu0 %388 }
 0xd08   :  { %v391_v15 = vadd.f32 %v389_v14, %v381_v12 }
 0xd0a   :  { %660 = vtanh.f32 %v391_v15 }
 0xd10   :  { %v661_v16 = vpop.eup %660 }
 0xd11   :  { %394 = vrot.lane.b32.xlu1 %v661_v16, %s687_s3 }
 0xd83   :  { %v395_v21 = vpop.permute.xlu1 %394 }
 0xd84   :  { %v874_v22 = vmul.f32 %v395_v21, %v380_v8 }
 0xd86   :  { %v398_v23 = vpack.c.bf16 %v874_v22, %v874_v22  ;;  %v493_v35 = vrot.slane %v874_v22, 4 }
 0xd88   :  { %400 = vrot.lane.b32.xlu2 %v398_v23, %s688_s13  ;;  %v501_v8 = vsel %vm498_vm4, %v854_v60, %v493_v35 }
 0xde2   :  { %v401_v24 = vpop.permute.xlu2 %400 }
 0xde3   :  { %625 = vmatmul.msk.bf16.vlgmr.msrb.gmra.mxu0 %vm67_vm0, %v401_v24 }
 0xe60   :  { %v414_v27 = vpop.f32.mrf.mxu0 }
 0xe61   :  { %v418_v28 = vadd.f32 %v414_v27, %v103_v26 }
 0xe63   :  { %v419_v29 = vmul.f32 0.5, %v418_v28 }
 0xe65   :  { %v420_v30 = vsel %vm773_vm3, %v418_v28, %v419_v29 }
 0xe66   :  { %662 = vtanh.f32 %v420_v30 }
 0xe68   :  { %v416_v31 = vpop.f32.mrf.mxu0 }
 0xe6c   :  { %v663_v33 = vpop.eup %662 }
 0xe6d   :  { %v422_v34 = vadd.f32 1.0, %v663_v33 }
 0xe6f   :  { %v423_v36 = vmul.f32 0.5, %v422_v34 }
 0xe71   :  { %v424_v37 = vsel %vm773_vm3, %v663_v33, %v423_v36 }
 0xe72   :  { %427 = vrot.lane.b32.xlu0 %v424_v37, %s687_s3  ;;  %v425_v11 = vmul.f32 %v424_v37, %v391_v15 }
 0xee4   :  { %v428_v38 = vpop.permute.xlu0 %427 }
 0xee5   :  { %v430_v39 = vmul.f32 %v428_v38, %v424_v37 }
 0xee7   :  { %432 = vrot.lane.b32.xlu1 %v430_v39, %s688_s13 }
 0xf59   :  { %v433_v40 = vpop.permute.xlu1 %432 }
 0xf5a   :  { %v435_v41 = vadd.f32 %v433_v40, %v425_v11 }
 0xf5c   :  { %664 = vtanh.f32 %v435_v41 }
 0xf62   :  { %v665_v42 = vpop.eup %664 }
 0xf63   :  { %438 = vrot.lane.b32.xlu2 %v665_v42, %s687_s3 }
 0xfbd   :  { %v439_v43 = vpop.permute.xlu2 %438 }
 0xfbe   :  { %v441_v44 = vmul.f32 %v439_v43, %v424_v37 }
 0xfc0   :  { %v442_v45 = vpack.c.bf16 %v441_v44, %v441_v44 }
 0xfc2   :  { %444 = vrot.lane.b32.xlu0 %v442_v45, %s688_s13 }
0x1034   :  { %v445_v46 = vpop.permute.xlu0 %444 }
0x1035   :  { %626 = vmatmul.msk.bf16.vlgmr.msra.gmra.mxu1 %vm67_vm0, %v445_v46 }
0x10b2   :  { %v458_v48 = vpop.f32.mrf.mxu1 }
0x10b3   :  { %v462_v49 = vadd.f32 %v458_v48, %v112_v47 }
0x10b5   :  { %v463_v50 = vmul.f32 0.5, %v462_v49 }
0x10b7   :  { %v464_v51 = vsel %vm773_vm3, %v462_v49, %v463_v50 }
0x10b8   :  { %666 = vtanh.f32 %v464_v51 }
0x10ba   :  { %v460_v53 = vpop.f32.mrf.mxu1 }
0x10be   :  { %v667_v54 = vpop.eup %666 }
0x10bf   :  { %v466_v55 = vadd.f32 1.0, %v667_v54 }
0x10c1   :  { %v467_v56 = vmul.f32 0.5, %v466_v55 }
0x10c3   :  { %v468_v57 = vsel %vm773_vm3, %v667_v54, %v467_v56 }
0x10c4   :  { %471 = vrot.lane.b32.xlu1 %v468_v57, %s687_s3  ;;  %v469_v3 = vmul.f32 %v468_v57, %v435_v41 }
0x10cc   :  { %515 = vrot.lane.b32.xlu1 %v499_v59, %s688_s13 }
0x1136   :  { %v472_v52 = vpop.permute.xlu1 %471 }
0x1137   :  { %v474_v63 = vmul.f32 %v472_v52, %v468_v57 }
0x1139   :  { %476 = vrot.lane.b32.xlu2 %v474_v63, %s688_s13 }
0x113e   :  { %v516_v1 = vpop.permute.xlu1 %515 }
0x113f   :  { %627 = vmatmul.msk.f32.vlgmr.msrb.gmra.mxu2 %vm67_vm0, %v516_v1 }
0x1141   :  { %517 = vrot.lane.b32.xlu2 %v500_v2, %s688_s13 }
0x1193   :  { %v477_v4 = vpop.permute.xlu2 %476 }
0x1194   :  { %v479_v5 = vadd.f32 %v477_v4, %v469_v3 }
0x1196   :  { %668 = vtanh.f32 %v479_v5 }
0x119b   :  { %v518_v6 = vpop.permute.xlu2 %517 }
0x119c   :  { %v669_v7 = vpop.eup %668  ;;  %628 = vmatmul.msk.f32.gmra.mxu2 %vm67_vm0, %v518_v6 }
0x119d   :  { %482 = vrot.lane.b32.xlu0 %v669_v7, %s687_s3 }
0x11a5   :  { %519 = vrot.lane.b32.xlu0 %v501_v8, %s688_s13 }
0x11c2   :  { %v548_v9 = vpop.f32.mrf.mxu2 }
0x11c3   :  { %v549_v10 = vadd.f32 %v637_v13, %v548_v9 }
0x11c5   :  { %560 = vmax.xlane.f32.xlu2 %v549_v10 }
0x120f   :  { %v483_v12 = vpop.permute.xlu0 %482 }
0x1210   :  { %v485_v14 = vmul.f32 %v483_v12, %v468_v57 }
0x1212   :  { %v496_v15 = vrot.slane %v485_v14, 4 }
0x1214   :  { %v502_v16 = vsel %vm498_vm4, %v441_v44, %v496_v15 }
0x1215   :  { %521 = vrot.lane.b32.xlu1 %v502_v16, %s688_s13 }
0x1217   :  { %v520_v18 = vpop.permute.xlu0 %519 }
0x1218   :  { %629 = vmatmul.msk.f32.gmra.mxu2 %vm67_vm0, %v520_v18 }
0x121f   :  { %v551_v60 = vpop.f32.mrf.mxu2 }
0x1220   :  { %v552_v19 = vadd.f32 %v637_v13, %v551_v60 }
0x1222   :  { %562 = vmax.xlane.f32.xlu0 %v552_v19 }
0x1238   :  { %v561_v27 = vpop.xlane.xlu2 %560 }
0x1239   :  { %v568_v28 = vsub.f32 %v549_v10, %v561_v27 }
0x123b   :  { %v572_v29 = vmul.f32 1.442695, %v568_v28 }
0x1287   :  { %v522_v20 = vpop.permute.xlu1 %521 }
0x1288   :  { %630 = vmatmul.msk.f32.gmra.mxu2 %vm67_vm0, %v522_v20 }
0x1295   :  { %v563_v21 = vpop.xlane.xlu0 %562 }
0x1296   :  { %v569_v22 = vsub.f32 %v552_v19, %v563_v21 }
0x1298   :  { %v574_v23 = vmul.f32 1.442695, %v569_v22 }
0x129a   :  { %670 = vpow2.f32 %v574_v23 }
0x129b   :  { %v554_v24 = vpop.f32.mrf.mxu2  ;;  %672 = vpow2.f32 %v572_v29 }
0x129c   :  { %v555_v25 = vadd.f32 %v637_v13, %v554_v24 }
0x129e   :  { %564 = vmax.xlane.f32.xlu1 %v555_v25 }
0x12a0   :  { %v671_v26 = vpop.eup %670 }
0x12a1   :  { %582 = vadd.xlane.f32.xlu0 %v671_v26  ;;  %v673_v38 = vpop.eup %672 }
0x130b   :  { %v557_v30 = vpop.f32.mrf.mxu2 }
0x130c   :  { %v558_v31 = vadd.f32 %v637_v13, %v557_v30 }
0x130e   :  { %566 = vmax.xlane.f32.xlu2 %v558_v31 }
0x1311   :  { %v565_v33 = vpop.xlane.xlu1 %564 }
0x1312   :  { %v570_v34 = vsub.f32 %v555_v25, %v565_v33 }
0x1314   :  { %v576_v36 = vmul.f32 1.442695, %v570_v34  ;;  %v583_v37 = vpop.xlane.xlu0 %582 }
0x1315   :  { %674 = vlog2.f32 %v583_v37 }
0x1316   :  { %676 = vpow2.f32 %v576_v36  ;;  %580 = vadd.xlane.f32.xlu2 %v673_v38 }
0x131b   :  { %v675_v39 = vpop.eup %674 }
0x131c   :  { %v677_v11 = vpop.eup %676  ;;  %v591_v40 = vmul.f32 0.6931472, %v675_v39 }
0x131d   :  { %584 = vadd.xlane.f32.xlu1 %v677_v11 }
0x131e   :  { %v597_v41 = vsub.f32 %v569_v22, %v591_v40 }
0x1320   :  { %601 = vst [vmem:[%s948_s6 + $0x8] sm:$0xff] %v597_v41 }
0x1381   :  { %v567_v42 = vpop.xlane.xlu2 %566 }
0x1382   :  { %v571_v43 = vsub.f32 %v558_v31, %v567_v42 }
0x1384   :  { %v578_v44 = vmul.f32 1.442695, %v571_v43 }
0x1386   :  { %678 = vpow2.f32 %v578_v44 }
0x1389   :  { %v581_v45 = vpop.xlane.xlu2 %580 }
0x138a   :  { %680 = vlog2.f32 %v581_v45 }
0x138c   :  { %v679_v46 = vpop.eup %678 }
0x138d   :  { %586 = vadd.xlane.f32.xlu2 %v679_v46 }
0x1390   :  { %v681_v47 = vpop.eup %680  ;;  %v585_v48 = vpop.xlane.xlu1 %584 }
0x1391   :  { %v589_v49 = vmul.f32 0.6931472, %v681_v47  ;;  %682 = vlog2.f32 %v585_v48 }
0x1393   :  { %v596_v50 = vsub.f32 %v568_v28, %v589_v49 }
0x1395   :  { %600 = vst [vmem:[%s948_s6] sm:$0xff] %v596_v50 }
0x1397   :  { %v683_v51 = vpop.eup %682 }
0x1398   :  { %v593_v53 = vmul.f32 0.6931472, %v683_v51 }
0x139a   :  { %v598_v54 = vsub.f32 %v570_v34, %v593_v53 }
0x139c   :  { %602 = vst [vmem:[%s948_s6 + $0x10] sm:$0xff] %v598_v54 }
0x1400   :  { %v587_v55 = vpop.xlane.xlu2 %586 }
0x1401   :  { %684 = vlog2.f32 %v587_v55 }
0x1407   :  { %v685_v56 = vpop.eup %684 }
0x1408   :  { %v595_v57 = vmul.f32 0.6931472, %v685_v56 }
0x140a   :  { %v599_v58 = vsub.f32 %v571_v43, %v595_v57 }
0x140c   :  { %603 = vst [vmem:[%s948_s6 + $0x18] sm:$0xff] %v599_v58 }

</bundles_post_ra>
